<compile_context>
chip_gen: v7x
topology: tpu7x:2x2x1
jax: 0.10.0
libtpu: 0.0.40
codegen_flags: <defaults>
</compile_context>

<pallas_src>
import jax
import jax.numpy as jnp
from jax import lax
from jax.experimental import pallas as pl
from jax.experimental.pallas import tpu as pltpu

_LANES = 128
_SUBLANES = 8
# Total HBM bytes streamed per grid step (shared across fused inputs).
_TARGET_STEP_BYTES = 8 * 1024 * 1024
_VMEM_HEADROOM_BYTES = 4 * 1024 * 1024


def _make_block_sum_kernel(num_inputs, rows_total, block_rows, num_blocks):
    """Kernel reducing one (block_rows, 128) tile per input to a (1, 8, 128) f32 partial."""
    has_edge = (rows_total % block_rows) != 0
    rows_mult8 = (block_rows % _SUBLANES) == 0
    # A partial edge block only occurs when block_rows is the (multiple-of-8) default.
    assert rows_mult8 or not has_edge

    def _reduce(x, row0, masked):
        x = x.astype(jnp.float32)
        if masked:
            row_ids = row0 + lax.broadcasted_iota(jnp.int32, x.shape, 0)
            x = jnp.where(row_ids < rows_total, x, 0.0)
        if rows_mult8:
            # Collapse to an (8, 128) partial: pure VPU vreg adds, unmasked vst.
            s = x.reshape(block_rows // _SUBLANES, _SUBLANES, _LANES).sum(axis=0)
        else:
            # Tiny single-block case (rows < 8 or not a multiple of 8).
            s1 = jnp.sum(x, axis=0, keepdims=True)
            s = jnp.concatenate(
                [s1, jnp.zeros((_SUBLANES - 1, _LANES), jnp.float32)], axis=0
            )
        return s.reshape(1, _SUBLANES, _LANES)

    def kernel(*refs):
        in_refs = refs[:num_inputs]
        out_refs = refs[num_inputs:]
        i = pl.program_id(0)

        def _do(masked):
            row0 = i * block_rows
            for in_ref, out_ref in zip(in_refs, out_refs):
                out_ref[...] = _reduce(in_ref[...], row0, masked)

        if not has_edge:
            _do(masked=False)
        else:
            @pl.when(i < num_blocks - 1)
            def _full():
                _do(masked=False)

            @pl.when(i == num_blocks - 1)
            def _edge():
                _do(masked=True)

    return kernel


def _pallas_partial_sums(arrays_2d):
    """Float32 sum of each (rows, 128) array (all sharing `rows`) via one fused pallas_call."""
    num_inputs = len(arrays_2d)
    rows = arrays_2d[0].shape[0]

    # Dtype- and fusion-aware block sizing: ~_TARGET_STEP_BYTES streamed per step.
    per_input_bytes = max(_TARGET_STEP_BYTES // num_inputs, 1 << 20)
    itemsize = max(a.dtype.itemsize for a in arrays_2d)
    default_rows = max(
        _SUBLANES,
        (per_input_bytes // (_LANES * itemsize)) // _SUBLANES * _SUBLANES,
    )
    block_rows = min(default_rows, rows)
    num_blocks = pl.cdiv(rows, block_rows)

    kernel = _make_block_sum_kernel(num_inputs, rows, block_rows, num_blocks)

    in_specs = [pl.BlockSpec((block_rows, _LANES), lambda i: (i, 0)) for _ in arrays_2d]
    out_specs = [
        pl.BlockSpec((1, _SUBLANES, _LANES), lambda i: (i, 0, 0)) for _ in arrays_2d
    ]
    out_shape = tuple(
        jax.ShapeDtypeStruct((num_blocks, _SUBLANES, _LANES), jnp.float32)
        for _ in arrays_2d
    )

    in_bytes = sum(a.size * a.dtype.itemsize for a in arrays_2d)
    out_bytes = num_inputs * num_blocks * _SUBLANES * _LANES * 4
    # Double-buffered inputs + outputs + headroom; safe on v5e/v6e (128 MiB
    # physical) and v7x (64 MiB physical / 32 MiB default scoped).
    vmem_limit = (
        2 * sum(block_rows * _LANES * a.dtype.itemsize for a in arrays_2d)
        + 2 * num_inputs * _SUBLANES * _LANES * 4
        + _VMEM_HEADROOM_BYTES
    )
    vmem_limit = max(vmem_limit, 20 * 1024 * 1024)

    partials = pl.pallas_call(
        kernel,
        out_shape=out_shape,
        grid_spec=pltpu.PrefetchScalarGridSpec(
            num_scalar_prefetch=0,
            grid=(num_blocks,),
            in_specs=in_specs,
            out_specs=out_specs,
        ),
        compiler_params=pltpu.CompilerParams(
            dimension_semantics=("parallel",),
            vmem_limit_bytes=vmem_limit,
        ),
        cost_estimate=pl.CostEstimate(
            flops=sum(a.size for a in arrays_2d),
            transcendentals=0,
            bytes_accessed=in_bytes + out_bytes,
        ),
    )(*arrays_2d)

    return [jnp.sum(p, dtype=jnp.float32) for p in partials]


def _split_aligned(x):
    """Lane-aligned (rows, 128) view (or None) plus the <=127-element ragged tail."""
    flat = x.reshape(-1)  # metadata-only for contiguous inputs
    n = flat.shape[0]
    rows = n // _LANES
    aligned = flat[: rows * _LANES].reshape(rows, _LANES) if rows > 0 else None
    tail = flat[rows * _LANES:]
    return aligned, tail


def mse_loss_llp(input_arr, target_arr):
    """(mean(input) - mean(target)) ** 2, matching MSELoss_LLP.forward."""
    x2d, x_tail = _split_aligned(input_arr)
    t2d, t_tail = _split_aligned(target_arr)

    if x2d is not None and t2d is not None and x2d.shape[0] == t2d.shape[0]:
        # Common case: equal padded row counts -> one fused pallas_call.
        sum_x, sum_t = _pallas_partial_sums([x2d, t2d])
    else:
        sum_x = (
            _pallas_partial_sums([x2d])[0]
            if x2d is not None
            else jnp.zeros((), jnp.float32)
        )
        sum_t = (
            _pallas_partial_sums([t2d])[0]
            if t2d is not None
            else jnp.zeros((), jnp.float32)
        )

    sum_x = sum_x + jnp.sum(x_tail, dtype=jnp.float32)
    sum_t = sum_t + jnp.sum(t_tail, dtype=jnp.float32)

    mean_x = sum_x / input_arr.size  # empty tensor -> nan, like torch.mean
    mean_t = sum_t / target_arr.size
    diff = mean_x - mean_t
    loss = diff * diff

    out_dtype = jnp.promote_types(input_arr.dtype, target_arr.dtype)
    if not jnp.issubdtype(out_dtype, jnp.floating):
        out_dtype = jnp.float32
    return loss.astype(out_dtype)


if __name__ == "__main__":
    key = jax.random.PRNGKey(0)
    kx, kt = jax.random.split(key)

    # Typical module-sized inputs (batch=2, channels=4, spatial=16x16): fused path.
    x = jax.random.normal(kx, (2, 4, 16, 16), dtype=jnp.float32)
    t = jax.random.normal(kt, (2, 4, 16, 16), dtype=jnp.float32)
    loss = mse_loss_llp(x, t)
    jax.block_until_ready(loss)
    ref = (jnp.mean(x) - jnp.mean(t)) ** 2
    assert jnp.allclose(loss, ref, atol=1e-6, rtol=1e-5), (loss, ref)

    # Multi-block path with a masked edge block + unequal / non-multiple-of-128 sizes.
    x2 = jax.random.normal(kx, (40000, 128), dtype=jnp.float32)
    t2 = jax.random.normal(kt, (3, 5, 7), dtype=jnp.float32)
    loss2 = mse_loss_llp(x2, t2)
    jax.block_until_ready(loss2)
    ref2 = (jnp.mean(x2) - jnp.mean(t2)) ** 2
    assert jnp.allclose(loss2, ref2, atol=1e-6, rtol=1e-5), (loss2, ref2)

    # bf16 fused path (dtype-aware block sizing; loss cast back to bf16 like torch).
    x3 = jax.random.normal(kx, (2, 4, 16, 16), dtype=jnp.bfloat16)
    t3 = jax.random.normal(kt, (2, 4, 16, 16), dtype=jnp.bfloat16)
    loss3 = mse_loss_llp(x3, t3)
    jax.block_until_ready(loss3)
    ref3 = (
        (jnp.mean(x3.astype(jnp.float32)) - jnp.mean(t3.astype(jnp.float32))) ** 2
    ).astype(jnp.bfloat16)
    assert loss3.dtype == jnp.bfloat16
    assert jnp.allclose(
        loss3.astype(jnp.float32), ref3.astype(jnp.float32), atol=1e-4, rtol=5e-2
    ), (loss3, ref3)

    print("KERNEL_OK")
</pallas_src>

<mosaic_0001>
module attributes {stable_mosaic.version = 11 : i64} {
  func.func @kernel(%arg0: i32, %arg1: memref<16x128xf32, #tpu.memory_space<vmem>>, %arg2: memref<16x128xf32, #tpu.memory_space<vmem>>, %arg3: memref<1x8x128xf32, #tpu.memory_space<vmem>>, %arg4: memref<1x8x128xf32, #tpu.memory_space<vmem>>) attributes {dimension_semantics = [#tpu.dimension_semantics<parallel>], iteration_bounds = array<i64: 1>, scalar_prefetch = 0 : i64, scratch_operands = 0 : i64, tpu.core_type = #tpu.core_type<tc>, window_params = [{transform_indices = @transform_0, window_bounds = array<i64: 16, 128>}, {transform_indices = @transform_1, window_bounds = array<i64: 16, 128>}, {transform_indices = @transform_2, window_bounds = array<i64: 1, 8, 128>}, {transform_indices = @transform_3, window_bounds = array<i64: 1, 8, 128>}]} {
    %c0 = arith.constant 0 : index
    %c0_0 = arith.constant 0 : index
    %0 = vector.load %arg1[%c0, %c0_0] : memref<16x128xf32, #tpu.memory_space<vmem>>, vector<16x128xf32>
    %1 = vector.shape_cast %0 : vector<16x128xf32> to vector<2x8x128xf32>
    %cst = arith.constant dense<0.000000e+00> : vector<8x128xf32>
    %2 = vector.multi_reduction <add>, %1, %cst [0] : vector<2x8x128xf32> to vector<8x128xf32>
    %3 = vector.shape_cast %2 : vector<8x128xf32> to vector<1x8x128xf32>
    %c0_1 = arith.constant 0 : index
    %c0_2 = arith.constant 0 : index
    %c0_3 = arith.constant 0 : index
    %4 = vector.load %arg3[%c0_1, %c0_2, %c0_3] : memref<1x8x128xf32, #tpu.memory_space<vmem>>, vector<1x8x128xf32>
    tpu.vector_store %arg3[%c0_1, %c0_2, %c0_3], %3 {strides = array<i32>} : memref<1x8x128xf32, #tpu.memory_space<vmem>>, vector<1x8x128xf32>,
    %c0_4 = arith.constant 0 : index
    %c0_5 = arith.constant 0 : index
    %5 = vector.load %arg2[%c0_4, %c0_5] : memref<16x128xf32, #tpu.memory_space<vmem>>, vector<16x128xf32>
    %6 = vector.shape_cast %5 : vector<16x128xf32> to vector<2x8x128xf32>
    %cst_6 = arith.constant dense<0.000000e+00> : vector<8x128xf32>
    %7 = vector.multi_reduction <add>, %6, %cst_6 [0] : vector<2x8x128xf32> to vector<8x128xf32>
    %8 = vector.shape_cast %7 : vector<8x128xf32> to vector<1x8x128xf32>
    %c0_7 = arith.constant 0 : index
    %c0_8 = arith.constant 0 : index
    %c0_9 = arith.constant 0 : index
    %9 = vector.load %arg4[%c0_7, %c0_8, %c0_9] : memref<1x8x128xf32, #tpu.memory_space<vmem>>, vector<1x8x128xf32>
    tpu.vector_store %arg4[%c0_7, %c0_8, %c0_9], %8 {strides = array<i32>} : memref<1x8x128xf32, #tpu.memory_space<vmem>>, vector<1x8x128xf32>,
    return
  }
  func.func @transform_0(%arg0: i32) -> (i32, i32) {
    %c0_i32 = arith.constant 0 : i32
    %c0_i32_0 = arith.constant 0 : i32
    return %arg0, %c0_i32 : i32, i32
  }
  func.func @transform_1(%arg0: i32) -> (i32, i32) {
    %c0_i32 = arith.constant 0 : i32
    %c0_i32_0 = arith.constant 0 : i32
    return %arg0, %c0_i32 : i32, i32
  }
  func.func @transform_2(%arg0: i32) -> (i32, i32, i32) {
    %c0_i32 = arith.constant 0 : i32
    %c0_i32_0 = arith.constant 0 : i32
    %c0_i32_1 = arith.constant 0 : i32
    return %arg0, %c0_i32, %c0_i32_0 : i32, i32, i32
  }
  func.func @transform_3(%arg0: i32) -> (i32, i32, i32) {
    %c0_i32 = arith.constant 0 : i32
    %c0_i32_0 = arith.constant 0 : i32
    %c0_i32_1 = arith.constant 0 : i32
    return %arg0, %c0_i32, %c0_i32_0 : i32, i32, i32
  }
}

</mosaic_0001>

<bundles_post_ra>
// kernel: tpu_custom_call.1
= control target key start
LH: loop header
LB: loop body
LE: loop exit
PB: predicated region body
PF: predicated region fallthrough
CT: control target
= control target key end

     0   :  { %9 = vsyncpa [#allocation3], 0  ;;  %s257_s0 = inlined_call_operand.hbm [shape: f32[16,128], index: 0, kind: input, shape index: {}]   ;;  %s258_s1 = inlined_call_operand.hbm [shape: f32[16,128], index: 1, kind: input, shape index: {}]   ;;  %s259_s2 = inlined_call_operand.hbm [shape: f32[1,8,128], index: 2, kind: output, shape index: {0}]   ;;  %s260_s3 = inlined_call_operand.hbm [shape: f32[1,8,128], index: 3, kind: output, shape index: {1}]  }
   0x1   :  { %10 = vsyncpa [#allocation6], 0 }
   0x2   :  { %11 = vsyncpa [#allocation4], 0 }
   0x3   :  { %12 = vsyncpa [#allocation9], 0  ;;  %s183_s12 = smov [#allocation2]   ;;  %s87_s16 = scalar_lea.hbm %s257_s0, 256 }
   0x4   :  { %s18_s13 = sshll.u32 %s183_s12, 4  ;;  %p88_p0 = scmp.ne.s32.totalorder %s257_s0, %s87_s16  ;;  %s19_s13 = int_to_ptr.vmem [resolvable:$true] %s18_s13 }
   0x5   :  { %p91_p1 = scmp.lt.u32.totalorder %s87_s16, %s257_s0 }
   0x7   :  { %p93_p2 = pnand %p91_p1, %p88_p0 }
   0x9   :  { %96 = shalt.err (!%p93_p2)
}
   0xa   :  { %s97_s21 = scalar_lea.vmem %s19_s13, 256  ;;  %p102_p4 = scmp.lt.s32.totalorder %s19_s13, %s19_s13 }
   0xb   :  { %p98_p3 = scmp.ne.s32.totalorder %s19_s13, %s97_s21  ;;  %p103_p5 = scmp.lt.s32.totalorder %s97_s21, %s97_s21 }
   0xd   :  { %p104_p6 = por %p103_p5, %p102_p4 }
   0xf   :  { %p105_p7 = pnand %p104_p6, %p98_p3 }
  0x11   :  { %108 = shalt.err (!%p105_p7)
}
  0x12   :  { %s184_s22 = smov 128   ;;  %s185_s23 = smov 8  }
  0x13   :  { %24 = dma.hbm_to_vmem [thread:$0]  %s257_s0, 256, %s19_s13, [#allocation3], %s184_s22, %s184_s22, %s185_s23  }
  0x14   :  { %s186_s26 = smov [#allocation5]   ;;  %s109_s30 = scalar_lea.hbm %s258_s1, 256 }
  0x15   :  { %s30_s27 = sshll.u32 %s186_s26, 4  ;;  %p110_p8 = scmp.ne.s32.totalorder %s258_s1, %s109_s30  ;;  %s31_s27 = int_to_ptr.vmem [resolvable:$true] %s30_s27 }
  0x16   :  { %p113_p9 = scmp.lt.u32.totalorder %s109_s30, %s258_s1 }
  0x18   :  { %p115_p10 = pnand %p113_p9, %p110_p8 }
  0x1a   :  { %118 = shalt.err (!%p115_p10)
}
  0x1b   :  { %s119_s8 = scalar_lea.vmem %s31_s27, 256  ;;  %p124_p12 = scmp.lt.s32.totalorder %s31_s27, %s31_s27 }
  0x1c   :  { %p120_p11 = scmp.ne.s32.totalorder %s31_s27, %s119_s8  ;;  %p125_p13 = scmp.lt.s32.totalorder %s119_s8, %s119_s8 }
  0x1e   :  { %p126_p0 = por %p125_p13, %p124_p12 }
  0x20   :  { %p127_p1 = pnand %p126_p0, %p120_p11 }
  0x22   :  { %130 = shalt.err (!%p127_p1)
}
  0x23   :  { %36 = dma.hbm_to_vmem [thread:$0]  %s258_s1, 256, %s31_s27, [#allocation6], %s184_s22, %s184_s22, %s185_s23  }
  0x24   :  { %175 = dma.done.wait [#allocation3], 256  }
  0x25   :  { %176 = vsyncadd [#allocation3], 4294967040 }
  0x26   :  { %177 = dma.done.wait [#allocation6], 256  }
  0x27   :  { %178 = vsyncadd [#allocation6], 4294967040  ;;  %s187_s10 = smov [#allocation7]   ;;  %s188_s12 = smov [#allocation8]   ;;  %v43_v0 = vld [vmem:[#allocation2] sm:$0xff]  ;;  %v44_v1 = vld [vmem:[#allocation2 + $0x8] sm:$0xff] }
  0x28   :  { %s57_s11 = sshll.u32 %s187_s10, 4  ;;  %s67_s13 = sshll.u32 %s188_s12, 4  ;;  %v47_v2 = vld [vmem:[#allocation5] sm:$0xff]  ;;  %v45_v3 = vadd.f32 %v44_v1, %v43_v0  ;;  %v48_v4 = vld [vmem:[#allocation5 + $0x8] sm:$0xff]  ;;  %s58_s11 = int_to_ptr.vmem [resolvable:$true] %s57_s11  ;;  %s68_s13 = int_to_ptr.vmem [resolvable:$true] %s67_s13 }
  0x29   :  { %v49_v5 = vadd.f32 %v48_v4, %v47_v2  ;;  %s131_s14 = scalar_lea.vmem %s58_s11, 128  ;;  %p136_p3 = scmp.lt.s32.totalorder %s58_s11, %s58_s11 }
  0x2a   :  { %46 = vst [vmem:[#allocation7] sm:$0xff] %v45_v3  ;;  %p132_p2 = scmp.ne.s32.totalorder %s58_s11, %s131_s14  ;;  %p137_p4 = scmp.lt.s32.totalorder %s131_s14, %s131_s14 }
  0x2b   :  { %50 = vst [vmem:[#allocation8] sm:$0xff] %v49_v5 }
  0x2c   :  { %p138_p5 = por %p137_p4, %p136_p3 }
  0x2e   :  { %p139_p6 = pnand %p138_p5, %p132_p2 }
  0x30   :  { %142 = shalt.err (!%p139_p6)
}
  0x31   :  { %s143_s16 = scalar_lea.hbm %s259_s2, 128 }
  0x32   :  { %p144_p7 = scmp.ne.s32.totalorder %s259_s2, %s143_s16  ;;  %p147_p8 = scmp.lt.u32.totalorder %s143_s16, %s259_s2 }
  0x34   :  { %p149_p9 = pnand %p147_p8, %p144_p7 }
  0x36   :  { %152 = shalt.err (!%p149_p9)
}
  0x37   :  { %60 = dma.vmem_to_hbm [thread:$0]  %s58_s11, 128, %s259_s2, [#allocation4]  }
  0x38   :  { %s153_s23 = scalar_lea.vmem %s68_s13, 128  ;;  %p158_p11 = scmp.lt.s32.totalorder %s68_s13, %s68_s13 }
  0x39   :  { %p154_p10 = scmp.ne.s32.totalorder %s68_s13, %s153_s23  ;;  %p159_p12 = scmp.lt.s32.totalorder %s153_s23, %s153_s23 }
  0x3b   :  { %p160_p13 = por %p159_p12, %p158_p11 }
  0x3d   :  { %p161_p0 = pnand %p160_p13, %p154_p10 }
  0x3f   :  { %164 = shalt.err (!%p161_p0)
}
  0x40   :  { %s165_s26 = scalar_lea.hbm %s260_s3, 128 }
  0x41   :  { %p166_p1 = scmp.ne.s32.totalorder %s260_s3, %s165_s26  ;;  %p169_p2 = scmp.lt.u32.totalorder %s165_s26, %s260_s3 }
  0x43   :  { %p171_p3 = pnand %p169_p2, %p166_p1 }
  0x45   :  { %174 = shalt.err (!%p171_p3)
}
  0x46   :  { %70 = dma.vmem_to_hbm [thread:$0]  %s68_s13, 128, %s260_s3, [#allocation9]  }
  0x47   :  { %179 = dma.done.wait [#allocation4], 128  }
  0x48   :  { %180 = vsyncadd [#allocation4], 4294967168 }
  0x49   :  { %181 = dma.done.wait [#allocation9], 128  }
  0x4a   :  { %182 = vsyncadd [#allocation9], 4294967168 }
  0x4b   :  { %77 = vsyncpa [#allocation3], 1 }
  0x4c   :  { %78 = vsyncpa [#allocation6], 1 }
  0x4d   :  { %79 = vsyncpa [#allocation4], 1 }
  0x4e   :  { %80 = vsyncpa [#allocation9], 1 }

</bundles_post_ra>
